<compile_context>
chip_gen: v7x
topology: tpu7x:2x2x1
jax: 0.10.0
libtpu: 0.0.40
codegen_flags: <defaults>
</compile_context>

<pallas_src>
import jax
import jax.numpy as jnp
from jax.experimental import pallas as pl
from jax.experimental.pallas import tpu as pltpu


def _round_up(x, m):
    return ((x + m - 1) // m) * m


def _pick_hot(H1, W1, max_rows=2048):
    """Rows-per-block: divides H1, HOT*W1 is a multiple of 128 (lane-dense, legal block),
    capped so the row block stays ~<=2048 spatial positions."""
    cands = [d for d in range(1, H1 + 1) if H1 % d == 0 and (d * W1) % 128 == 0]
    if not cands:
        return H1                      # full-extent block is always legal
    good = [d for d in cands if d * W1 <= max_rows]
    return max(good) if good else min(cands)


# -----------------------------------------------------------------------------
# Kernel A: composed projection at source resolution   z = x @ (proj_w @ fuse_w_i)
# -----------------------------------------------------------------------------
def _proj_kernel(x_ref, w_ref, o_ref):
    o_ref[...] = jnp.dot(
        x_ref[...], w_ref[...], preferred_element_type=jnp.float32
    ).astype(o_ref.dtype)


def proj_lowres(x2d_bf16, w_bf16):
    """x2d: (M, K) bf16 pixels x channels; w: (K, E) bf16 -> (M, E) bf16."""
    M, K = x2d_bf16.shape
    E = w_bf16.shape[1]
    Mp = _round_up(M, 8)
    if Mp != M:
        x2d_bf16 = jnp.pad(x2d_bf16, ((0, Mp - M), (0, 0)))
    if Mp <= 2048:
        tm = Mp
    else:
        tm = next(t for t in range(2048, 7, -8) if Mp % t == 0)
    out = pl.pallas_call(
        _proj_kernel,
        out_shape=jax.ShapeDtypeStruct((Mp, E), jnp.bfloat16),
        grid_spec=pltpu.PrefetchScalarGridSpec(
            num_scalar_prefetch=0,
            grid=(Mp // tm,),
            in_specs=[
                pl.BlockSpec((tm, K), lambda i: (i, 0)),
                pl.BlockSpec((K, E), lambda i: (0, 0)),
            ],
            out_specs=pl.BlockSpec((tm, E), lambda i: (i, 0)),
        ),
        compiler_params=pltpu.CompilerParams(
            dimension_semantics=("parallel",),
            vmem_limit_bytes=32 * 1024 * 1024,
        ),
    )(x2d_bf16, w_bf16)
    return out[:M] if Mp != M else out


# -----------------------------------------------------------------------------
# Bilinear interpolation tables (align_corners=False, matches F.interpolate)
# -----------------------------------------------------------------------------
def bilinear_width_matrix(out_size, in_size):
    o = jnp.arange(out_size, dtype=jnp.float32)
    src = (o + 0.5) * (in_size / out_size) - 0.5
    src = jnp.clip(src, 0.0, float(in_size - 1))
    i0 = jnp.floor(src).astype(jnp.int32)
    i1 = jnp.minimum(i0 + 1, in_size - 1)
    frac = src - i0.astype(jnp.float32)
    w = jnp.zeros((out_size, in_size), jnp.float32)
    idx = jnp.arange(out_size)
    w = w.at[idx, i0].add(1.0 - frac)
    w = w.at[idx, i1].add(frac)
    return w


def bilinear_height_taps(out_size, in_size):
    """Per-output-row 2-tap indices + 1/2^24 fixed-point fraction (int32 for SMEM)."""
    o = jnp.arange(out_size, dtype=jnp.float32)
    src = (o + 0.5) * (in_size / out_size) - 0.5
    src = jnp.clip(src, 0.0, float(in_size - 1))
    i0 = jnp.floor(src).astype(jnp.int32)
    i1 = jnp.minimum(i0 + 1, in_size - 1)
    frac = src - i0.astype(jnp.float32)
    fq = jnp.round(frac * 16777216.0).astype(jnp.int32)
    return i0, i1, fq


# -----------------------------------------------------------------------------
# Kernel B: fused head -- batched c1 projection + bilinear upsample of z2/z3/z4
#           + folded BN + ReLU + batched class projection, NCHW-flat output
# -----------------------------------------------------------------------------
def fused_head(idx0, idx1, fracq, x1flat, wc1, z2, ww2, z3, ww3, z4, ww4,
               bn_scale, bn_shift, pred_wT, pred_bT):
    N, C1, HW = x1flat.shape
    E = wc1.shape[1]
    NC = pred_wT.shape[0]
    W1 = ww2.shape[0]
    H1 = HW // W1
    h2, w2 = z2.shape[1], z2.shape[2]
    h3, w3 = z3.shape[1], z3.shape[2]
    h4, w4 = z4.shape[1], z4.shape[2]
    HOT = _pick_hot(H1, W1)
    nrb = H1 // HOT
    P = HOT * W1                       # spatial positions per grid step

    def kernel(idx0_ref, idx1_ref, fracq_ref,
               x1_ref, wc1_ref, z2_ref, ww2_ref, z3_ref, ww3_ref,
               z4_ref, ww4_ref, sc_ref, sh_ref, pwt_ref, pbt_ref,
               o_ref, acc_ref):
        rb = pl.program_id(1)

        # --- full-res c1 branch: one batched MXU matmul over the whole row block ---
        # x1 block is NCHW-flat (C1, P); contract C1 (dim0/dim0, "A^T @ B" form).
        c1acc = jax.lax.dot_general(
            x1_ref[...].astype(jnp.bfloat16), wc1_ref[...],
            (((0,), (0,)), ((), ())),
            preferred_element_type=jnp.float32)                        # (P, E) f32

        # --- c2/c3/c4 branches: 2-tap height blend + width-interp matmul per row ---
        ww = (ww2_ref[...], ww3_ref[...], ww4_ref[...])                # hoisted loads
        zref = (z2_ref, z3_ref, z4_ref)
        for t in range(HOT):                                           # static unroll
            ho = rb * HOT + t
            contrib = None
            for s in range(3):
                a0 = idx0_ref[s, ho]
                a1 = idx1_ref[s, ho]
                f = fracq_ref[s, ho].astype(jnp.float32) * (1.0 / 16777216.0)
                row = (1.0 - f) * zref[s][a0] + f * zref[s][a1]        # (w_s, E) f32
                c = jnp.dot(ww[s], row.astype(jnp.bfloat16),
                            preferred_element_type=jnp.float32)        # (W1, E) f32
                contrib = c if contrib is None else contrib + c
            acc_ref[pl.ds(t * W1, W1), :] = contrib

        # --- folded BN + ReLU and class projection, batched over the row block ---
        fused = c1acc + acc_ref[...]
        fused = jnp.maximum(fused * sc_ref[...] + sh_ref[...], 0.0)    # (P, E) f32
        logits = jax.lax.dot_general(
            pwt_ref[...], fused.astype(jnp.bfloat16),
            (((1,), (1,)), ((), ())),
            preferred_element_type=jnp.float32)                        # (NC, P) f32
        o_ref[...] = (logits + pbt_ref[...]).astype(o_ref.dtype)       # NCHW-flat store

    return pl.pallas_call(
        kernel,
        out_shape=jax.ShapeDtypeStruct((N, NC, HW), jnp.float32),
        grid_spec=pltpu.PrefetchScalarGridSpec(
            num_scalar_prefetch=3,            # idx0, idx1, fracq -> SMEM
            grid=(N, nrb),
            in_specs=[
                pl.BlockSpec((None, C1, P), lambda n, r, *_: (n, 0, r)),     # c1 NCHW-flat
                pl.BlockSpec((C1, E), lambda n, r, *_: (0, 0)),
                pl.BlockSpec((None, h2, w2, E), lambda n, r, *_: (n, 0, 0, 0)),
                pl.BlockSpec((W1, w2), lambda n, r, *_: (0, 0)),
                pl.BlockSpec((None, h3, w3, E), lambda n, r, *_: (n, 0, 0, 0)),
                pl.BlockSpec((W1, w3), lambda n, r, *_: (0, 0)),
                pl.BlockSpec((None, h4, w4, E), lambda n, r, *_: (n, 0, 0, 0)),
                pl.BlockSpec((W1, w4), lambda n, r, *_: (0, 0)),
                pl.BlockSpec((1, E), lambda n, r, *_: (0, 0)),               # bn scale
                pl.BlockSpec((1, E), lambda n, r, *_: (0, 0)),               # bn shift
                pl.BlockSpec((NC, E), lambda n, r, *_: (0, 0)),              # pred_w^T
                pl.BlockSpec((NC, 1), lambda n, r, *_: (0, 0)),              # pred_b
            ],
            out_specs=pl.BlockSpec((None, NC, P), lambda n, r, *_: (n, 0, r)),
            scratch_shapes=[pltpu.VMEM((P, E), jnp.float32)],
        ),
        compiler_params=pltpu.CompilerParams(
            dimension_semantics=("parallel", "parallel"),
            vmem_limit_bytes=32 * 1024 * 1024,
        ),
    )(idx0, idx1, fracq, x1flat, wc1, z2, ww2, z3, ww3, z4, ww4,
      bn_scale, bn_shift, pred_wT, pred_bT)


# -----------------------------------------------------------------------------
# SegFormerHead parameters + forward
# -----------------------------------------------------------------------------
def init_segformer_head(key, in_channels, embedding_dim, num_classes):
    ks = jax.random.split(key, 16)
    params = {}
    for i, c in enumerate(in_channels):
        params[f"proj{i + 1}_w"] = 0.02 * jax.random.normal(
            ks[2 * i], (c, embedding_dim), jnp.float32)
        params[f"proj{i + 1}_b"] = 0.02 * jax.random.normal(
            ks[2 * i + 1], (embedding_dim,), jnp.float32)
    # linear_fuse: Conv2d(4E -> E, k=1, bias=False because BN follows) + BN + ReLU
    params["fuse_w"] = 0.02 * jax.random.normal(
        ks[8], (4 * embedding_dim, embedding_dim), jnp.float32)
    params["bn_gamma"] = 1.0 + 0.1 * jax.random.normal(ks[9], (embedding_dim,), jnp.float32)
    params["bn_beta"] = 0.1 * jax.random.normal(ks[10], (embedding_dim,), jnp.float32)
    params["bn_mean"] = 0.1 * jax.random.normal(ks[11], (embedding_dim,), jnp.float32)
    params["bn_var"] = 1.0 + 0.5 * jax.random.uniform(ks[12], (embedding_dim,), jnp.float32)
    # linear_pred: Conv2d(E -> num_classes, k=1) with bias
    params["pred_w"] = 0.02 * jax.random.normal(
        ks[13], (embedding_dim, num_classes), jnp.float32)
    params["pred_b"] = 0.02 * jax.random.normal(ks[14], (num_classes,), jnp.float32)
    return params


def segformer_head_forward(params, feats_nchw, embedding_dim, num_classes, bn_eps=1e-5):
    c1, c2, c3, c4 = feats_nchw
    N, C1, H1, W1 = c1.shape
    E = embedding_dim

    # --- compose each branch's Linear with its row-slice of linear_fuse ---
    # torch.cat order is [_c4, _c3, _c2, _c1] along channels.
    fuse_w = params["fuse_w"]
    wf4, wf3, wf2, wf1 = (fuse_w[0:E], fuse_w[E:2 * E],
                          fuse_w[2 * E:3 * E], fuse_w[3 * E:4 * E])
    wc4 = (params["proj4_w"] @ wf4).astype(jnp.bfloat16)
    wc3 = (params["proj3_w"] @ wf3).astype(jnp.bfloat16)
    wc2 = (params["proj2_w"] @ wf2).astype(jnp.bfloat16)
    wc1 = (params["proj1_w"] @ wf1).astype(jnp.bfloat16)
    fused_bias = (params["proj4_b"] @ wf4 + params["proj3_b"] @ wf3
                  + params["proj2_b"] @ wf2 + params["proj1_b"] @ wf1)

    # --- eval-mode BatchNorm folded to scale/shift; proj biases folded into shift ---
    scale = params["bn_gamma"] * jax.lax.rsqrt(params["bn_var"] + bn_eps)
    shift = params["bn_beta"] - params["bn_mean"] * scale + scale * fused_bias

    # --- low-res branches: composed projection at SOURCE resolution (bf16) ---
    zs, wws, taps = [], [], []
    for x, wc in ((c2, wc2), (c3, wc3), (c4, wc4)):
        n, cc, h, w = x.shape
        x2d = jnp.transpose(x, (0, 2, 3, 1)).reshape(n * h * w, cc).astype(jnp.bfloat16)
        zs.append(proj_lowres(x2d, wc).reshape(n, h, w, E))
        wws.append(bilinear_width_matrix(W1, w).astype(jnp.bfloat16))
        taps.append(bilinear_height_taps(H1, h))
    idx0 = jnp.stack([t[0] for t in taps])      # (3, H1) int32
    idx1 = jnp.stack([t[1] for t in taps])      # (3, H1) int32
    fracq = jnp.stack([t[2] for t in taps])     # (3, H1) int32 fixed-point fractions

    # --- full-res c1 branch stays in NCHW; only a free row-major reshape ---
    x1flat = c1.reshape(N, C1, H1 * W1)

    # --- class projection weights: unpadded, pre-transposed for (NC, P) output ---
    pred_wT = params["pred_w"].T.astype(jnp.bfloat16)                  # (NC, E)
    pred_bT = params["pred_b"].reshape(num_classes, 1).astype(jnp.float32)

    out_flat = fused_head(idx0, idx1, fracq, x1flat, wc1,
                          zs[0], wws[0], zs[1], wws[1], zs[2], wws[2],
                          scale.reshape(1, E), shift.reshape(1, E),
                          pred_wT, pred_bT)
    # Kernel already emitted NCHW-flat unpadded logits; this reshape is metadata-only.
    return out_flat.reshape(N, num_classes, H1, W1)


if __name__ == "__main__":
    key = jax.random.PRNGKey(0)
    in_channels = (4, 8, 16, 32)
    feature_strides = (4, 8, 16, 32)
    embedding_dim = 32
    num_classes = 5
    N = 2
    base = 64  # "image" size -> c1 is 16x16 at stride 4

    k_feat, k_param = jax.random.split(key)
    fkeys = jax.random.split(k_feat, 4)
    feats = []
    for i, (c, s) in enumerate(zip(in_channels, feature_strides)):
        h = w = base // s
        feats.append(jax.random.normal(fkeys[i], (N, c, h, w), jnp.float32))

    params = init_segformer_head(k_param, in_channels, embedding_dim, num_classes)
    out = segformer_head_forward(params, feats, embedding_dim, num_classes)
    out = jax.block_until_ready(out)
    assert out.shape == (N, num_classes, base // feature_strides[0], base // feature_strides[0])
    print("KERNEL_OK")
</pallas_src>

<mosaic_0001>
module attributes {stable_mosaic.version = 11 : i64} {
  func.func @_proj_kernel(%arg0: i32, %arg1: memref<128x8xbf16, #tpu.memory_space<vmem>>, %arg2: memref<8x32xbf16, #tpu.memory_space<vmem>>, %arg3: memref<128x32xbf16, #tpu.memory_space<vmem>>) attributes {dimension_semantics = [#tpu.dimension_semantics<parallel>], iteration_bounds = array<i64: 1>, scalar_prefetch = 0 : i64, scratch_operands = 0 : i64, tpu.core_type = #tpu.core_type<tc>, window_params = [{transform_indices = @transform_0, window_bounds = array<i64: 128, 8>}, {pipeline_mode = #tpu.pipeline_mode<synchronous>, transform_indices = @transform_1, window_bounds = array<i64: 8, 32>}, {transform_indices = @transform_2, window_bounds = array<i64: 128, 32>}]} {
    %c0 = arith.constant 0 : index
    %c0_0 = arith.constant 0 : index
    %0 = vector.load %arg1[%c0, %c0_0] : memref<128x8xbf16, #tpu.memory_space<vmem>>, vector<128x8xbf16>
    %c0_1 = arith.constant 0 : index
    %c0_2 = arith.constant 0 : index
    %1 = vector.load %arg2[%c0_1, %c0_2] : memref<8x32xbf16, #tpu.memory_space<vmem>>, vector<8x32xbf16>
    %cst = arith.constant dense<0.000000e+00> : vector<128x32xf32>
    %2 = tpu.matmul %0, %1, %cst {dimension_numbers = #tpu.dot_dimension_numbers<[1], [0], [0], [1], [0, 0, 1, 1], [], []>} : vector<128x8xbf16>, vector<8x32xbf16>, vector<128x32xf32> -> vector<128x32xf32>
    %3 = arith.truncf %2 : vector<128x32xf32> to vector<128x32xbf16>
    %c0_3 = arith.constant 0 : index
    %c0_4 = arith.constant 0 : index
    %4 = vector.load %arg3[%c0_3, %c0_4] : memref<128x32xbf16, #tpu.memory_space<vmem>>, vector<128x32xbf16>
    tpu.vector_store %arg3[%c0_3, %c0_4], %3 {strides = array<i32>} : memref<128x32xbf16, #tpu.memory_space<vmem>>, vector<128x32xbf16>,
    return
  }
  func.func @transform_0(%arg0: i32) -> (i32, i32) {
    %c0_i32 = arith.constant 0 : i32
    %c0_i32_0 = arith.constant 0 : i32
    return %arg0, %c0_i32 : i32, i32
  }
  func.func @transform_1(%arg0: i32) -> (i32, i32) {
    %c0_i32 = arith.constant 0 : i32
    %c0_i32_0 = arith.constant 0 : i32
    %c0_i32_1 = arith.constant 0 : i32
    return %c0_i32, %c0_i32_0 : i32, i32
  }
  func.func @transform_2(%arg0: i32) -> (i32, i32) {
    %c0_i32 = arith.constant 0 : i32
    %c0_i32_0 = arith.constant 0 : i32
    return %arg0, %c0_i32 : i32, i32
  }
}

</mosaic_0001>

<bundles_post_ra>
// kernel: tpu_custom_call.1
= control target key start
LH: loop header
LB: loop body
LE: loop exit
PB: predicated region body
PF: predicated region fallthrough
CT: control target
= control target key end

     0   :  { %vm94_vm0 = vcmask 1043456   ;;  %vm69_vm1 = vcmask 64512   ;;  %vm259_vm2 = vcmask 257024   ;;  %s481_s1 = inlined_call_operand.vmem [shape: bf16[8,32], index: 1, kind: input, shape index: {}]   ;;  %s482_s0 = inlined_call_operand.vmem [shape: bf16[128,8], index: 0, kind: input, shape index: {}]   ;;  %s483_s2 = inlined_call_operand.vmem [shape: bf16[128,32], index: 2, kind: output, shape index: {}]  }
   0x1   :  { %v28_v0 = vld [vmem:[%s481_s1] sm:$0xf]  ;;  %v361_v4 = vld [vmem:[%s482_s0 + $0x8] sm:$0xff]   ;;  %v363_v6 = vld [vmem:[%s482_s0 + $0x10] sm:$0xff]  }
   0x2   :  { %357 = vmatprep.subr.msk.bf16.mxu0 %vm94_vm0, %v28_v0  ;;  %358 = vmatprep.subr.msk.bf16.mxu1 %vm94_vm0, %v28_v0  ;;  %v96_v1 = vsel %vm94_vm0, %v28_v0, 0  ;;  %v359_v2 = vld [vmem:[%s482_s0] sm:$0xff]   ;;  %v362_v5 = vld [vmem:[%s482_s0 + $0x28] sm:$0xff]   ;;  %v364_v7 = vld [vmem:[%s482_s0 + $0x30] sm:$0xff]  }
   0x3   :  { %338 = vmatpush3.bf16.msra.mxu0 %v96_v1  ;;  %356 = vmatpush3.bf16.msra.mxu1 %v96_v1  ;;  %v360_v3 = vld [vmem:[%s482_s0 + $0x20] sm:$0xff]   ;;  %v365_v8 = vld [vmem:[%s482_s0 + $0x18] sm:$0xff]  }
   0x4   :  { %339 = vmatprep.mubr.msk.bf16.mxu0 %vm69_vm1, %v359_v2  ;;  %347 = vmatprep.mubr.msk.bf16.mxu1 %vm69_vm1, %v360_v3  ;;  %v366_v9 = vld [vmem:[%s482_s0 + $0x38] sm:$0xff]  }
   0x6   :  { %340 = vmatmul.mubr.msk.bf16.vlgmr.msra.gmra.mrb[0].mxu0 %vm69_vm1, %v361_v4  ;;  %348 = vmatmul.mubr.msk.bf16.vlgmr.msra.gmra.mrb[0].mxu1 %vm69_vm1, %v362_v5 }
   0x7   :  { %343 = vmatprep.mubr.msk.bf16.mxu0 %vm69_vm1, %v363_v6  ;;  %351 = vmatprep.mubr.msk.bf16.mxu1 %vm69_vm1, %v364_v7 }
   0xe   :  { %344 = vmatmul.mubr.msk.bf16.gmra.mrb[4].mxu0 %vm69_vm1, %v365_v8  ;;  %352 = vmatmul.mubr.msk.bf16.gmra.mrb[4].mxu1 %vm69_vm1, %v366_v9 }
  0xd9   :  { %v341_v10 = vpop.f32.mrb[0].mxu0  ;;  %v349_v12 = vpop.f32.mrb[0].mxu1 }
  0xda   :  { %v314_v11 = vpack.c.bf16 %v341_v10, %v341_v10  ;;  %v132_v13 = vpop.f32.mrb[1].mxu0  ;;  %v322_v14 = vpack.c.bf16 %v349_v12, %v349_v12  ;;  %v164_v16 = vpop.f32.mrb[1].mxu1 }
  0xdb   :  { %v312_v15 = vpack.c.bf16 %v132_v13, %v132_v13  ;;  %v342_v17 = vpop.f32.mrb[2].mxu0  ;;  %v320_v18 = vpack.c.bf16 %v164_v16, %v164_v16  ;;  %v350_v20 = vpop.f32.mrb[2].mxu1 }
  0xdc   :  { %262 = vst.msk [vmem:[%s483_s2 + $0x8] sm:$0xf] %vm259_vm2, %v314_v11  ;;  %v315_v19 = vpack.c.bf16 %v342_v17, %v342_v17  ;;  %v135_v21 = vpop.f32.mrb[3].mxu0  ;;  %270 = vst.msk [vmem:[%s483_s2 + $0x28] sm:$0xf] %vm259_vm2, %v322_v14  ;;  %v323_v22 = vpack.c.bf16 %v350_v20, %v350_v20  ;;  %v167_v24 = vpop.f32.mrb[3].mxu1 }
  0xdd   :  { %260 = vst.msk [vmem:[%s483_s2] sm:$0xf] %vm259_vm2, %v312_v15  ;;  %v313_v23 = vpack.c.bf16 %v135_v21, %v135_v21  ;;  %268 = vst.msk [vmem:[%s483_s2 + $0x20] sm:$0xf] %vm259_vm2, %v320_v18  ;;  %v321_v25 = vpack.c.bf16 %v167_v24, %v167_v24 }
  0xde   :  { %263 = vst.msk [vmem:[%s483_s2 + $0xc] sm:$0xf] %vm259_vm2, %v315_v19  ;;  %271 = vst.msk [vmem:[%s483_s2 + $0x2c] sm:$0xf] %vm259_vm2, %v323_v22 }
  0xdf   :  { %261 = vst.msk [vmem:[%s483_s2 + $0x4] sm:$0xf] %vm259_vm2, %v313_v23  ;;  %269 = vst.msk [vmem:[%s483_s2 + $0x24] sm:$0xf] %vm259_vm2, %v321_v25 }
  0xe1   :  { %v345_v26 = vpop.f32.mrb[4].mxu0  ;;  %v353_v28 = vpop.f32.mrb[4].mxu1 }
  0xe2   :  { %v318_v27 = vpack.c.bf16 %v345_v26, %v345_v26  ;;  %v148_v29 = vpop.f32.mrb[5].mxu0  ;;  %v326_v30 = vpack.c.bf16 %v353_v28, %v353_v28  ;;  %v180_v32 = vpop.f32.mrb[5].mxu1 }
  0xe3   :  { %v316_v31 = vpack.c.bf16 %v148_v29, %v148_v29  ;;  %v346_v33 = vpop.f32.mrb[6].mxu0  ;;  %v324_v34 = vpack.c.bf16 %v180_v32, %v180_v32  ;;  %v354_v36 = vpop.f32.mrb[6].mxu1 }
  0xe4   :  { %266 = vst.msk [vmem:[%s483_s2 + $0x18] sm:$0xf] %vm259_vm2, %v318_v27  ;;  %v319_v35 = vpack.c.bf16 %v346_v33, %v346_v33  ;;  %v151_v37 = vpop.f32.mrb[7].mxu0  ;;  %274 = vst.msk [vmem:[%s483_s2 + $0x38] sm:$0xf] %vm259_vm2, %v326_v30  ;;  %v327_v38 = vpack.c.bf16 %v354_v36, %v354_v36  ;;  %v183_v40 = vpop.f32.mrb[7].mxu1 }
  0xe5   :  { %264 = vst.msk [vmem:[%s483_s2 + $0x10] sm:$0xf] %vm259_vm2, %v316_v31  ;;  %v317_v39 = vpack.c.bf16 %v151_v37, %v151_v37  ;;  %272 = vst.msk [vmem:[%s483_s2 + $0x30] sm:$0xf] %vm259_vm2, %v324_v34  ;;  %v325_v41 = vpack.c.bf16 %v183_v40, %v183_v40 }
  0xe6   :  { %267 = vst.msk [vmem:[%s483_s2 + $0x1c] sm:$0xf] %vm259_vm2, %v319_v35  ;;  %275 = vst.msk [vmem:[%s483_s2 + $0x3c] sm:$0xf] %vm259_vm2, %v327_v38 }
  0xe7   :  { %265 = vst.msk [vmem:[%s483_s2 + $0x14] sm:$0xf] %vm259_vm2, %v317_v39  ;;  %273 = vst.msk [vmem:[%s483_s2 + $0x34] sm:$0xf] %vm259_vm2, %v325_v41 }

</bundles_post_ra>
